<compile_context>
chip_gen: v7x
topology: tpu7x:2x2x1
jax: 0.10.0
libtpu: 0.0.40
codegen_flags: <defaults>
</compile_context>

<pallas_src>
import functools

import jax
import jax.numpy as jnp
from jax.experimental import pallas as pl
from jax.experimental.pallas import tpu as pltpu

LANE = 128


def _round_up(n: int, m: int) -> int:
    return ((n + m - 1) // m) * m


def make_twinnet_kernel(num_layers: int, bn: bool, batch: int, mxu_bf16: bool):
    """Fused MLP kernel over lane-padded (multiple-of-128) feature dims.

    Ref order:
      x_ref,
      [w_j, b_j, (gamma_j, beta_j if bn and j != last)] for each layer j,
      out_ref
    Everything is VMEM-resident (shapes are tiny).
    """
    inv_b = 1.0 / float(batch)

    def kernel(*refs):
        x_ref = refs[0]
        out_ref = refs[-1]
        idx = 1
        h = x_ref[...].astype(jnp.float32)
        for j in range(num_layers):
            w = refs[idx][...]
            b = refs[idx + 1][...].astype(jnp.float32)
            idx += 2
            if mxu_bf16:
                # v6e/v7x: bf16 MXU inputs at native rate, f32 accumulation.
                lhs = h.astype(jnp.bfloat16)
                rhs = w.astype(jnp.bfloat16)
            else:
                lhs = h
                rhs = w.astype(jnp.float32)
            # Linear: (B, in_pad) @ (in_pad, out_pad) + (1, out_pad)  -> MXU.
            h = jnp.dot(lhs, rhs, preferred_element_type=jnp.float32) + b
            if j != num_layers - 1:
                if bn:
                    gamma = refs[idx][...].astype(jnp.float32)
                    beta = refs[idx + 1][...].astype(jnp.float32)
                    idx += 2
                    # Fused BatchNorm1d (training mode), single pass over h:
                    #   var = E[h^2] - mean^2 ;  s = gamma * rsqrt(var + eps)
                    #   h   = h * s + (beta - mean * s)
                    mean = jnp.sum(h, axis=0, keepdims=True) * inv_b
                    msq = jnp.sum(h * h, axis=0, keepdims=True) * inv_b
                    var = jnp.maximum(msq - mean * mean, 0.0)
                    s = gamma * jax.lax.rsqrt(var + 1e-5)
                    h = h * s + (beta - mean * s)
                # ReLU
                h = jnp.maximum(h, 0.0)
        # Lane-dense (B, 128*k) store -> unmasked vst.
        out_ref[...] = h.astype(out_ref.dtype)

    return kernel


def init_twinnet_params(key, input_dim, hidden_layer, bn):
    """Deterministic init mimicking nn.Linear's U(-1/sqrt(fan_in), 1/sqrt(fan_in)).

    Weights are stored pre-transposed as (in, out); BN params as (1, h).
    Returns the *unpadded* params (used by the pure-JAX reference).
    """
    params = []
    d_in = input_dim
    num_layers = len(hidden_layer)
    for j, h in enumerate(hidden_layer):
        key, kw, kb = jax.random.split(key, 3)
        bound = 1.0 / (float(d_in) ** 0.5)
        w = jax.random.uniform(kw, (d_in, h), jnp.float32, -bound, bound)
        b = jax.random.uniform(kb, (1, h), jnp.float32, -bound, bound)
        params.extend([w, b])
        if j != num_layers - 1 and bn:
            params.append(jnp.ones((1, h), jnp.float32))   # gamma
            params.append(jnp.zeros((1, h), jnp.float32))  # beta
        d_in = h
    return params


def pad_params(params, input_dim, hidden_layer, bn):
    """Zero-pad every feature dim up to a multiple of 128 lanes (done once).

    Zero-padded weight rows/cols + zero bias/beta keep all padded columns
    identically zero through Linear, BN (var=0 -> output 0) and ReLU, so the
    padded network computes exactly the original network on the real columns.
    """
    padded = []
    idx = 0
    d_in = input_dim
    num_layers = len(hidden_layer)
    for j, h in enumerate(hidden_layer):
        d_in_pad = _round_up(d_in, LANE)
        h_pad = _round_up(h, LANE)
        w, b = params[idx], params[idx + 1]
        idx += 2
        padded.append(jnp.pad(w, ((0, d_in_pad - d_in), (0, h_pad - h))))
        padded.append(jnp.pad(b, ((0, 0), (0, h_pad - h))))
        if j != num_layers - 1 and bn:
            gamma, beta = params[idx], params[idx + 1]
            idx += 2
            padded.append(jnp.pad(gamma, ((0, 0), (0, h_pad - h)),
                                  constant_values=1.0))
            padded.append(jnp.pad(beta, ((0, 0), (0, h_pad - h))))
        d_in = h
    return padded


@functools.partial(
    jax.jit, static_argnames=("num_layers", "bn", "out_dim", "mxu_bf16")
)
def twinnet_forward(x, padded_params, *, num_layers, bn, out_dim, mxu_bf16=False):
    batch, d_in = x.shape
    d_in_pad = _round_up(d_in, LANE)
    # Layout plumbing only: present a lane-dense input slab to the kernel.
    x_pad = jnp.pad(x, ((0, 0), (0, d_in_pad - d_in)))
    out_dim_pad = padded_params[-1].shape[1]  # last layer's (padded) bias width

    kernel = make_twinnet_kernel(num_layers, bn, batch, mxu_bf16)
    vmem = pl.BlockSpec(memory_space=pltpu.MemorySpace.VMEM)
    out_pad = pl.pallas_call(
        kernel,
        out_shape=jax.ShapeDtypeStruct((batch, out_dim_pad), x.dtype),
        in_specs=[vmem] * (1 + len(padded_params)),
        out_specs=vmem,
    )(x_pad, *padded_params)
    # Slice the real output columns outside the kernel.
    return out_pad[:, :out_dim]


def twinnet_reference(x, params, num_layers, bn):
    """Pure-JAX reference (unpadded params, two-pass BN) for correctness."""
    h = x.astype(jnp.float32)
    idx = 0
    for j in range(num_layers):
        w, b = params[idx], params[idx + 1]
        idx += 2
        h = h @ w + b
        if j != num_layers - 1:
            if bn:
                gamma, beta = params[idx], params[idx + 1]
                idx += 2
                mean = jnp.mean(h, axis=0, keepdims=True)
                var = jnp.mean((h - mean) ** 2, axis=0, keepdims=True)
                h = (h - mean) * jax.lax.rsqrt(var + 1e-5) * gamma + beta
            h = jnp.maximum(h, 0.0)
    return h


if __name__ == "__main__":
    # TwinNet(input_dim=32, hidden_layer=[64, 64, 16], bn=True); batch = 8.
    # forward(x) only uses self.net; random_net is structurally identical, so the
    # same kernel covers random_forward too (just different params).
    batch = 8
    input_dim = 32
    hidden_layer = [64, 64, 16]
    bn = True
    num_layers = len(hidden_layer)

    key = jax.random.PRNGKey(0)
    key, kx = jax.random.split(key)
    x = jax.random.normal(kx, (batch, input_dim), jnp.float32)
    params = init_twinnet_params(key, input_dim, hidden_layer, bn)
    padded_params = pad_params(params, input_dim, hidden_layer, bn)

    # mxu_bf16=False keeps the strict 1e-4 check; set True on v6e/v7x for speed.
    out = twinnet_forward(
        x, padded_params,
        num_layers=num_layers, bn=bn, out_dim=hidden_layer[-1], mxu_bf16=False,
    )
    out = jax.block_until_ready(out)

    ref = twinnet_reference(x, params, num_layers, bn)
    assert out.shape == (batch, hidden_layer[-1])
    assert jnp.allclose(out, ref, atol=1e-4, rtol=1e-4), "mismatch vs reference"

    print("KERNEL_OK")
</pallas_src>

<mosaic_0001>
module attributes {stable_mosaic.version = 11 : i64} {
  func.func @kernel(%arg0: memref<8x128xf32, #tpu.memory_space<vmem>>, %arg1: memref<128x128xf32, #tpu.memory_space<vmem>>, %arg2: memref<1x128xf32, #tpu.memory_space<vmem>>, %arg3: memref<1x128xf32, #tpu.memory_space<vmem>>, %arg4: memref<1x128xf32, #tpu.memory_space<vmem>>, %arg5: memref<128x128xf32, #tpu.memory_space<vmem>>, %arg6: memref<1x128xf32, #tpu.memory_space<vmem>>, %arg7: memref<1x128xf32, #tpu.memory_space<vmem>>, %arg8: memref<1x128xf32, #tpu.memory_space<vmem>>, %arg9: memref<128x128xf32, #tpu.memory_space<vmem>>, %arg10: memref<1x128xf32, #tpu.memory_space<vmem>>, %arg11: memref<8x128xf32, #tpu.memory_space<vmem>>) attributes {dimension_semantics = [], scalar_prefetch = 0 : i64, scratch_operands = 0 : i64, tpu.core_type = #tpu.core_type<tc>} {
    %c0 = arith.constant 0 : index
    %c0_0 = arith.constant 0 : index
    %0 = vector.load %arg0[%c0, %c0_0] : memref<8x128xf32, #tpu.memory_space<vmem>>, vector<8x128xf32>
    %c0_1 = arith.constant 0 : index
    %c0_2 = arith.constant 0 : index
    %1 = vector.load %arg1[%c0_1, %c0_2] : memref<128x128xf32, #tpu.memory_space<vmem>>, vector<128x128xf32>
    %c0_3 = arith.constant 0 : index
    %c0_4 = arith.constant 0 : index
    %2 = vector.load %arg2[%c0_3, %c0_4] : memref<1x128xf32, #tpu.memory_space<vmem>>, vector<1x128xf32>
    %cst = arith.constant dense<0.000000e+00> : vector<8x128xf32>
    %3 = tpu.matmul %0, %1, %cst {dimension_numbers = #tpu.dot_dimension_numbers<[1], [0], [0], [1], [0, 0, 1, 1], [], []>} : vector<8x128xf32>, vector<128x128xf32>, vector<8x128xf32> -> vector<8x128xf32>
    %4 = vector.broadcast %2 : vector<1x128xf32> to vector<8x128xf32>
    %5 = arith.addf %3, %4 : vector<8x128xf32>
    %c0_5 = arith.constant 0 : index
    %c0_6 = arith.constant 0 : index
    %6 = vector.load %arg3[%c0_5, %c0_6] : memref<1x128xf32, #tpu.memory_space<vmem>>, vector<1x128xf32>
    %c0_7 = arith.constant 0 : index
    %c0_8 = arith.constant 0 : index
    %7 = vector.load %arg4[%c0_7, %c0_8] : memref<1x128xf32, #tpu.memory_space<vmem>>, vector<1x128xf32>
    %cst_9 = arith.constant dense<0.000000e+00> : vector<128xf32>
    %8 = vector.multi_reduction <add>, %5, %cst_9 [0] : vector<8x128xf32> to vector<128xf32>
    %9 = vector.shape_cast %8 : vector<128xf32> to vector<1x128xf32>
    %cst_10 = arith.constant 1.250000e-01 : f32
    %10 = vector.broadcast %cst_10 : f32 to vector<1x128xf32>
    %11 = arith.mulf %9, %10 : vector<1x128xf32>
    %12 = arith.mulf %5, %5 : vector<8x128xf32>
    %cst_11 = arith.constant dense<0.000000e+00> : vector<128xf32>
    %13 = vector.multi_reduction <add>, %12, %cst_11 [0] : vector<8x128xf32> to vector<128xf32>
    %14 = vector.shape_cast %13 : vector<128xf32> to vector<1x128xf32>
    %cst_12 = arith.constant 1.250000e-01 : f32
    %15 = vector.broadcast %cst_12 : f32 to vector<1x128xf32>
    %16 = arith.mulf %14, %15 : vector<1x128xf32>
    %17 = arith.mulf %11, %11 : vector<1x128xf32>
    %18 = arith.subf %16, %17 : vector<1x128xf32>
    %cst_13 = arith.constant 0.000000e+00 : f32
    %19 = vector.broadcast %cst_13 : f32 to vector<1x128xf32>
    %20 = arith.maximumf %18, %19 : vector<1x128xf32>
    %cst_14 = arith.constant 9.99999974E-6 : f32
    %21 = vector.broadcast %cst_14 : f32 to vector<1x128xf32>
    %22 = arith.addf %20, %21 : vector<1x128xf32>
    %23 = math.rsqrt %22 : vector<1x128xf32>
    %24 = arith.mulf %6, %23 : vector<1x128xf32>
    %25 = vector.broadcast %24 : vector<1x128xf32> to vector<8x128xf32>
    %26 = arith.mulf %5, %25 : vector<8x128xf32>
    %27 = arith.mulf %11, %24 : vector<1x128xf32>
    %28 = arith.subf %7, %27 : vector<1x128xf32>
    %29 = vector.broadcast %28 : vector<1x128xf32> to vector<8x128xf32>
    %30 = arith.addf %26, %29 : vector<8x128xf32>
    %cst_15 = arith.constant 0.000000e+00 : f32
    %31 = vector.broadcast %cst_15 : f32 to vector<8x128xf32>
    %32 = arith.maximumf %30, %31 : vector<8x128xf32>
    %c0_16 = arith.constant 0 : index
    %c0_17 = arith.constant 0 : index
    %33 = vector.load %arg5[%c0_16, %c0_17] : memref<128x128xf32, #tpu.memory_space<vmem>>, vector<128x128xf32>
    %c0_18 = arith.constant 0 : index
    %c0_19 = arith.constant 0 : index
    %34 = vector.load %arg6[%c0_18, %c0_19] : memref<1x128xf32, #tpu.memory_space<vmem>>, vector<1x128xf32>
    %cst_20 = arith.constant dense<0.000000e+00> : vector<8x128xf32>
    %35 = tpu.matmul %32, %33, %cst_20 {dimension_numbers = #tpu.dot_dimension_numbers<[1], [0], [0], [1], [0, 0, 1, 1], [], []>} : vector<8x128xf32>, vector<128x128xf32>, vector<8x128xf32> -> vector<8x128xf32>
    %36 = vector.broadcast %34 : vector<1x128xf32> to vector<8x128xf32>
    %37 = arith.addf %35, %36 : vector<8x128xf32>
    %c0_21 = arith.constant 0 : index
    %c0_22 = arith.constant 0 : index
    %38 = vector.load %arg7[%c0_21, %c0_22] : memref<1x128xf32, #tpu.memory_space<vmem>>, vector<1x128xf32>
    %c0_23 = arith.constant 0 : index
    %c0_24 = arith.constant 0 : index
    %39 = vector.load %arg8[%c0_23, %c0_24] : memref<1x128xf32, #tpu.memory_space<vmem>>, vector<1x128xf32>
    %cst_25 = arith.constant dense<0.000000e+00> : vector<128xf32>
    %40 = vector.multi_reduction <add>, %37, %cst_25 [0] : vector<8x128xf32> to vector<128xf32>
    %41 = vector.shape_cast %40 : vector<128xf32> to vector<1x128xf32>
    %cst_26 = arith.constant 1.250000e-01 : f32
    %42 = vector.broadcast %cst_26 : f32 to vector<1x128xf32>
    %43 = arith.mulf %41, %42 : vector<1x128xf32>
    %44 = arith.mulf %37, %37 : vector<8x128xf32>
    %cst_27 = arith.constant dense<0.000000e+00> : vector<128xf32>
    %45 = vector.multi_reduction <add>, %44, %cst_27 [0] : vector<8x128xf32> to vector<128xf32>
    %46 = vector.shape_cast %45 : vector<128xf32> to vector<1x128xf32>
    %cst_28 = arith.constant 1.250000e-01 : f32
    %47 = vector.broadcast %cst_28 : f32 to vector<1x128xf32>
    %48 = arith.mulf %46, %47 : vector<1x128xf32>
    %49 = arith.mulf %43, %43 : vector<1x128xf32>
    %50 = arith.subf %48, %49 : vector<1x128xf32>
    %cst_29 = arith.constant 0.000000e+00 : f32
    %51 = vector.broadcast %cst_29 : f32 to vector<1x128xf32>
    %52 = arith.maximumf %50, %51 : vector<1x128xf32>
    %cst_30 = arith.constant 9.99999974E-6 : f32
    %53 = vector.broadcast %cst_30 : f32 to vector<1x128xf32>
    %54 = arith.addf %52, %53 : vector<1x128xf32>
    %55 = math.rsqrt %54 : vector<1x128xf32>
    %56 = arith.mulf %38, %55 : vector<1x128xf32>
    %57 = vector.broadcast %56 : vector<1x128xf32> to vector<8x128xf32>
    %58 = arith.mulf %37, %57 : vector<8x128xf32>
    %59 = arith.mulf %43, %56 : vector<1x128xf32>
    %60 = arith.subf %39, %59 : vector<1x128xf32>
    %61 = vector.broadcast %60 : vector<1x128xf32> to vector<8x128xf32>
    %62 = arith.addf %58, %61 : vector<8x128xf32>
    %cst_31 = arith.constant 0.000000e+00 : f32
    %63 = vector.broadcast %cst_31 : f32 to vector<8x128xf32>
    %64 = arith.maximumf %62, %63 : vector<8x128xf32>
    %c0_32 = arith.constant 0 : index
    %c0_33 = arith.constant 0 : index
    %65 = vector.load %arg9[%c0_32, %c0_33] : memref<128x128xf32, #tpu.memory_space<vmem>>, vector<128x128xf32>
    %c0_34 = arith.constant 0 : index
    %c0_35 = arith.constant 0 : index
    %66 = vector.load %arg10[%c0_34, %c0_35] : memref<1x128xf32, #tpu.memory_space<vmem>>, vector<1x128xf32>
    %cst_36 = arith.constant dense<0.000000e+00> : vector<8x128xf32>
    %67 = tpu.matmul %64, %65, %cst_36 {dimension_numbers = #tpu.dot_dimension_numbers<[1], [0], [0], [1], [0, 0, 1, 1], [], []>} : vector<8x128xf32>, vector<128x128xf32>, vector<8x128xf32> -> vector<8x128xf32>
    %68 = vector.broadcast %66 : vector<1x128xf32> to vector<8x128xf32>
    %69 = arith.addf %67, %68 : vector<8x128xf32>
    %c0_37 = arith.constant 0 : index
    %c0_38 = arith.constant 0 : index
    %70 = vector.load %arg11[%c0_37, %c0_38] : memref<8x128xf32, #tpu.memory_space<vmem>>, vector<8x128xf32>
    tpu.vector_store %arg11[%c0_37, %c0_38], %69 {strides = array<i32>} : memref<8x128xf32, #tpu.memory_space<vmem>>, vector<8x128xf32>,
    return
  }
}

</mosaic_0001>

<bundles_post_ra>
// kernel: twinnet_forward.1
= control target key start
LH: loop header
LB: loop body
LE: loop exit
PB: predicated region body
PF: predicated region fallthrough
CT: control target
= control target key end

     0   :  { %16 = vsyncpa [#allocation3], 0  ;;  %s985_s0 = inlined_call_operand.vmem [shape: f32[8,128], index: 0, kind: input, shape index: {}]   ;;  %s986_s1 = inlined_call_operand.hbm [shape: f32[128,128], index: 1, kind: input, shape index: {}]   ;;  %s987_s2 = inlined_call_operand.vmem [shape: f32[1,128], index: 2, kind: input, shape index: {}]   ;;  %s988_s3 = inlined_call_operand.vmem [shape: f32[1,128], index: 3, kind: input, shape index: {}]   ;;  %s989_s4 = inlined_call_operand.vmem [shape: f32[1,128], index: 4, kind: input, shape index: {}]   ;;  %s990_s5 = inlined_call_operand.hbm [shape: f32[128,128], index: 5, kind: input, shape index: {}]   ;;  %s991_s6 = inlined_call_operand.vmem [shape: f32[1,128], index: 6, kind: input, shape index: {}]   ;;  %s992_s7 = inlined_call_operand.vmem [shape: f32[1,128], index: 7, kind: input, shape index: {}]   ;;  %s993_s8 = inlined_call_operand.vmem [shape: f32[1,128], index: 8, kind: input, shape index: {}]   ;;  %s994_s9 = inlined_call_operand.hbm [shape: f32[128,128], index: 9, kind: input, shape index: {}]   ;;  %s995_s10 = inlined_call_operand.vmem [shape: f32[1,128], index: 10, kind: input, shape index: {}]   ;;  %s996_s11 = inlined_call_operand.hbm [shape: f32[8,128], index: 11, kind: output, shape index: {}]  }
   0x1   :  { %17 = vsyncpa [#allocation6], 0 }
   0x2   :  { %18 = vsyncpa [#allocation4], 0  ;;  %s795_s17 = smov [#allocation5]   ;;  %s796_s19 = smov [#allocation2]  }
   0x3   :  { %s44_s18 = sshll.u32 %s795_s17, 4  ;;  %s26_s20 = sshll.u32 %s796_s19, 4  ;;  %s45_s18 = int_to_ptr.vmem [resolvable:$true] %s44_s18  ;;  %s864_s20 = int_to_ptr.vmem [resolvable:$true] %s26_s20 }
   0x4   :  { %s701_s23 = scalar_lea.hbm %s990_s5, 2048 }
   0x5   :  { %p702_p0 = scmp.ne.s32.totalorder %s990_s5, %s701_s23  ;;  %p705_p1 = scmp.lt.u32.totalorder %s701_s23, %s990_s5 }
   0x7   :  { %p707_p2 = pnand %p705_p1, %p702_p0 }
   0x9   :  { %710 = shalt.err (!%p707_p2)
}
   0xa   :  { %s711_s28 = scalar_lea.vmem %s45_s18, 2048  ;;  %p716_p4 = scmp.lt.s32.totalorder %s45_s18, %s45_s18 }
   0xb   :  { %p712_p3 = scmp.ne.s32.totalorder %s45_s18, %s711_s28  ;;  %p717_p5 = scmp.lt.s32.totalorder %s711_s28, %s711_s28 }
   0xd   :  { %p718_p6 = por %p717_p5, %p716_p4 }
   0xf   :  { %p719_p7 = pnand %p718_p6, %p712_p3 }
  0x11   :  { %722 = shalt.err (!%p719_p7)
}
  0x12   :  { %s797_s29 = smov 128   ;;  %s798_s30 = smov 8  }
  0x13   :  { %50 = dma.hbm_to_vmem [thread:$0]  %s990_s5, 2048, %s45_s18, [#allocation6], %s797_s29, %s797_s29, %s798_s30  }
  0x14   :  { %s723_s16 = scalar_lea.hbm %s986_s1, 2048 }
  0x15   :  { %p724_p8 = scmp.ne.s32.totalorder %s986_s1, %s723_s16  ;;  %p727_p9 = scmp.lt.u32.totalorder %s723_s16, %s986_s1 }
  0x17   :  { %p729_p10 = pnand %p727_p9, %p724_p8 }
  0x19   :  { %732 = shalt.err (!%p729_p10)
}
  0x1a   :  { %s733_s23 = scalar_lea.vmem %s864_s20, 2048  ;;  %p738_p12 = scmp.lt.s32.totalorder %s864_s20, %s864_s20 }
  0x1b   :  { %p734_p11 = scmp.ne.s32.totalorder %s864_s20, %s733_s23  ;;  %p739_p13 = scmp.lt.s32.totalorder %s733_s23, %s733_s23 }
  0x1d   :  { %p740_p0 = por %p739_p13, %p738_p12 }
  0x1f   :  { %p741_p1 = pnand %p740_p0, %p734_p11 }
  0x21   :  { %744 = shalt.err (!%p741_p1)
}
  0x22   :  { %32 = dma.hbm_to_vmem [thread:$0]  %s986_s1, 2048, %s864_s20, [#allocation3], %s797_s29, %s797_s29, %s798_s30  }
  0x23   :  { %s799_s24 = smov [#allocation7]   ;;  %s745_s28 = scalar_lea.hbm %s994_s9, 2048 }
  0x24   :  { %s62_s25 = sshll.u32 %s799_s24, 4  ;;  %p746_p2 = scmp.ne.s32.totalorder %s994_s9, %s745_s28  ;;  %s63_s25 = int_to_ptr.vmem [resolvable:$true] %s62_s25 }
  0x25   :  { %p749_p3 = scmp.lt.u32.totalorder %s745_s28, %s994_s9 }
  0x27   :  { %p751_p4 = pnand %p749_p3, %p746_p2 }
  0x29   :  { %754 = shalt.err (!%p751_p4)
}
  0x2a   :  { %s755_s16 = scalar_lea.vmem %s63_s25, 2048  ;;  %p760_p6 = scmp.lt.s32.totalorder %s63_s25, %s63_s25 }
  0x2b   :  { %p756_p5 = scmp.ne.s32.totalorder %s63_s25, %s755_s16  ;;  %p761_p7 = scmp.lt.s32.totalorder %s755_s16, %s755_s16 }
  0x2d   :  { %p762_p8 = por %p761_p7, %p760_p6 }
  0x2f   :  { %p763_p9 = pnand %p762_p8, %p756_p5 }
  0x31   :  { %766 = shalt.err (!%p763_p9)
}
  0x32   :  { %68 = dma.hbm_to_vmem [thread:$0]  %s994_s9, 2048, %s63_s25, [#allocation6], %s797_s29, %s797_s29, %s798_s30  }
  0x33   :  { %789 = dma.done.wait [#allocation3], 2048  }
  0x34   :  { %790 = vsyncadd [#allocation3], 4294965248 }
  0x35   :  { %791 = dma.done.wait [#allocation6], 4096  }
  0x36   :  { %792 = vsyncadd [#allocation6], 4294963200  ;;  %v800_v0 = vmov 0.0|0.0   ;;  %vm801_vm0 = vmmov 0   ;;  %v802_v1 = vmov 0.0   ;;  %v81_v2 = vld [vmem:[#allocation2] sm:$0xff] }
  0x37   :  { %616 = vmatprep.subr.bf16.mxu0 %v800_v0  ;;  %543 = vmatprep.mubr.msk.f32.mxu0 %vm801_vm0, %v802_v1  ;;  %v82_v3 = vld [vmem:[#allocation2 + $0x8] sm:$0xff]  ;;  %v83_v4 = vld [vmem:[#allocation2 + $0x10] sm:$0xff]  ;;  %v84_v6 = vld [vmem:[#allocation2 + $0x18] sm:$0xff] }
  0x38   :  { %640 = vmatprep.subr.bf16.mxu1 %v800_v0  ;;  %578 = vmatprep.mubr.msk.f32.mxu1 %vm801_vm0, %v802_v1  ;;  %v617_v5 = vpack.c.bf16 %v82_v3, %v81_v2  ;;  %v620_v7 = vpack.c.bf16 %v84_v6, %v83_v4  ;;  %v85_v8 = vld [vmem:[#allocation2 + $0x20] sm:$0xff]  ;;  %v86_v9 = vld [vmem:[#allocation2 + $0x28] sm:$0xff]  ;;  %v87_v11 = vld [vmem:[#allocation2 + $0x30] sm:$0xff] }
  0x39   :  { %v623_v10 = vpack.c.bf16 %v86_v9, %v85_v8  ;;  %v88_v12 = vld [vmem:[#allocation2 + $0x38] sm:$0xff]  ;;  %v89_v14 = vld [vmem:[#allocation2 + $0x40] sm:$0xff]  ;;  %v90_v15 = vld [vmem:[#allocation2 + $0x48] sm:$0xff] }
  0x3a   :  { %618 = vmatpush3.bf16.msra.mxu0 %v617_v5  ;;  %v626_v13 = vpack.c.bf16 %v88_v12, %v87_v11  ;;  %v629_v16 = vpack.c.bf16 %v90_v15, %v89_v14  ;;  %v91_v17 = vld [vmem:[#allocation2 + $0x50] sm:$0xff]  ;;  %v92_v18 = vld [vmem:[#allocation2 + $0x58] sm:$0xff]  ;;  %v93_v20 = vld [vmem:[#allocation2 + $0x60] sm:$0xff]  ;;  %v198_v11 = vlaneseq }
  0x3b   :  { %619 = vmatprep.subr.bf16.mxu0 %v800_v0  ;;  %v632_v19 = vpack.c.bf16 %v92_v18, %v91_v17  ;;  %v94_v21 = vld [vmem:[#allocation2 + $0x68] sm:$0xff]  ;;  %v95_v23 = vld [vmem:[#allocation2 + $0x70] sm:$0xff]  ;;  %v96_v24 = vld [vmem:[#allocation2 + $0x78] sm:$0xff] }
  0x3c   :  { %v635_v22 = vpack.c.bf16 %v94_v21, %v93_v20  ;;  %v638_v25 = vpack.c.bf16 %v96_v24, %v95_v23  ;;  %v80_v26 = vld [vmem:[%s985_s0] sm:$0xff]  ;;  %v214_v27 = vld [vmem:[#allocation5] sm:$0xff]  ;;  %v215_v28 = vld [vmem:[#allocation5 + $0x8] sm:$0xff]  ;;  %v199_v12 = vshrl.u32 %v198_v11, 7 }
  0x3d   :  { %v641_v29 = vpack.c.bf16 %v215_v28, %v214_v27  ;;  %v216_v30 = vld [vmem:[#allocation5 + $0x10] sm:$0xff]  ;;  %v217_v31 = vld [vmem:[#allocation5 + $0x18] sm:$0xff]  ;;  %v218_v33 = vld [vmem:[#allocation5 + $0x20] sm:$0xff] }
  0x3e   :  { %621 = vmatpush3.bf16.msra.mxu0 %v620_v7  ;;  %v644_v32 = vpack.c.bf16 %v217_v31, %v216_v30  ;;  %v219_v34 = vld [vmem:[#allocation5 + $0x28] sm:$0xff]  ;;  %v220_v36 = vld [vmem:[#allocation5 + $0x30] sm:$0xff]  ;;  %v221_v37 = vld [vmem:[#allocation5 + $0x38] sm:$0xff]  ;;  %v945_v14 = vsub.s32 0, %v199_v12 }
  0x3f   :  { %622 = vmatprep.subr.bf16.mxu0 %v800_v0  ;;  %642 = vmatpush3.bf16.msra.mxu1 %v641_v29  ;;  %v647_v35 = vpack.c.bf16 %v219_v34, %v218_v33  ;;  %v650_v38 = vpack.c.bf16 %v221_v37, %v220_v36  ;;  %v222_v39 = vld [vmem:[#allocation5 + $0x40] sm:$0xff]  ;;  %v223_v40 = vld [vmem:[#allocation5 + $0x48] sm:$0xff]  ;;  %v224_v42 = vld [vmem:[#allocation5 + $0x50] sm:$0xff] }
  0x40   :  { %643 = vmatprep.subr.bf16.mxu1 %v800_v0  ;;  %v653_v41 = vpack.c.bf16 %v223_v40, %v222_v39  ;;  %v225_v43 = vld [vmem:[#allocation5 + $0x58] sm:$0xff]  ;;  %v226_v45 = vld [vmem:[#allocation5 + $0x60] sm:$0xff]  ;;  %v227_v46 = vld [vmem:[#allocation5 + $0x68] sm:$0xff] }
  0x41   :  { %v656_v44 = vpack.c.bf16 %v225_v43, %v224_v42  ;;  %v659_v47 = vpack.c.bf16 %v227_v46, %v226_v45  ;;  %v228_v48 = vld [vmem:[#allocation5 + $0x70] sm:$0xff]  ;;  %v229_v49 = vld [vmem:[#allocation5 + $0x78] sm:$0xff]  ;;  %v351_v31 = vld [vmem:[#allocation7 + $0x20] sm:$0xff] }
  0x42   :  { %624 = vmatpush3.bf16.msra.mxu0 %v623_v10  ;;  %v662_v50 = vpack.c.bf16 %v229_v49, %v228_v48  ;;  %v457_v51 = vld [vmem:[%s987_s2] ss:$0 sm:$0xff]  ;;  %v349_v28 = vld [vmem:[#allocation7 + $0x10] sm:$0xff]  ;;  %v355_v37 = vld [vmem:[#allocation7 + $0x40] sm:$0xff] }
  0x43   :  { %625 = vmatprep.subr.bf16.mxu0 %v800_v0  ;;  %645 = vmatpush3.bf16.msra.mxu1 %v644_v32  ;;  %v175_v17 = vld [vmem:[%s989_s4] sm:$0x1]  ;;  %v352_v32 = vld [vmem:[#allocation7 + $0x28] sm:$0xff]  ;;  %v353_v34 = vld [vmem:[#allocation7 + $0x30] sm:$0xff] }
  0x44   :  { %646 = vmatprep.subr.bf16.mxu1 %v800_v0  ;;  %v350_v29 = vld [vmem:[#allocation7 + $0x18] sm:$0xff]  ;;  %v671_v33 = vpack.c.bf16 %v352_v32, %v351_v31  ;;  %v357_v40 = vld [vmem:[#allocation7 + $0x50] sm:$0xff]  ;;  %v359_v43 = vld [vmem:[#allocation7 + $0x60] sm:$0xff] }
  0x45   :  { %v668_v30 = vpack.c.bf16 %v350_v29, %v349_v28  ;;  %v361_v46 = vld [vmem:[#allocation7 + $0x70] sm:$0xff]  ;;  %v458_v49 = vld [vmem:[%s991_s6] ss:$0 sm:$0xff] }
  0x46   :  { %627 = vmatpush3.bf16.msra.mxu0 %v626_v13  ;;  %v174_v13 = vld [vmem:[%s988_s3] sm:$0x1] }
  0x47   :  { %628 = vmatprep.subr.bf16.mxu0 %v800_v0  ;;  %648 = vmatpush3.bf16.msra.mxu1 %v647_v35  ;;  %v354_v35 = vld [vmem:[#allocation7 + $0x38] sm:$0xff] }
  0x48   :  { %649 = vmatprep.subr.bf16.mxu1 %v800_v0  ;;  %v674_v36 = vpack.c.bf16 %v354_v35, %v353_v34  ;;  %v308_v11 = vld [vmem:[%s993_s8] sm:$0x1] }
  0x4a   :  { %630 = vmatpush3.bf16.msra.mxu0 %v629_v16 }
  0x4b   :  { %631 = vmatprep.subr.bf16.mxu0 %v800_v0  ;;  %651 = vmatpush3.bf16.msra.mxu1 %v650_v38  ;;  %v356_v38 = vld [vmem:[#allocation7 + $0x48] sm:$0xff] }
  0x4c   :  { %652 = vmatprep.subr.bf16.mxu1 %v800_v0  ;;  %v677_v39 = vpack.c.bf16 %v356_v38, %v355_v37 }
  0x4e   :  { %633 = vmatpush3.bf16.msra.mxu0 %v632_v19 }
  0x4f   :  { %634 = vmatprep.subr.bf16.mxu0 %v800_v0  ;;  %654 = vmatpush3.bf16.msra.mxu1 %v653_v41  ;;  %v358_v41 = vld [vmem:[#allocation7 + $0x58] sm:$0xff] }
  0x50   :  { %655 = vmatprep.subr.bf16.mxu1 %v800_v0  ;;  %v680_v42 = vpack.c.bf16 %v358_v41, %v357_v40 }
  0x52   :  { %636 = vmatpush3.bf16.msra.mxu0 %v635_v22 }
  0x53   :  { %637 = vmatprep.subr.bf16.mxu0 %v800_v0  ;;  %657 = vmatpush3.bf16.msra.mxu1 %v656_v44  ;;  %v360_v44 = vld [vmem:[#allocation7 + $0x68] sm:$0xff] }
  0x54   :  { %658 = vmatprep.subr.bf16.mxu1 %v800_v0  ;;  %v683_v45 = vpack.c.bf16 %v360_v44, %v359_v43 }
  0x56   :  { %639 = vmatpush3.bf16.msra.mxu0 %v638_v25  ;;  %v347_v25 = vld [vmem:[#allocation7] sm:$0xff] }
  0x57   :  { %664 = vmatprep.subr.bf16.mxu0 %v800_v0  ;;  %660 = vmatpush3.bf16.msra.mxu1 %v659_v47  ;;  %v362_v47 = vld [vmem:[#allocation7 + $0x78] sm:$0xff] }
  0x58   :  { %661 = vmatprep.subr.bf16.mxu1 %v800_v0  ;;  %v686_v48 = vpack.c.bf16 %v362_v47, %v361_v46 }
  0x59   :  { %544 = vmatmul.mubr.f32.vlgmr.msra.gmra.mrb[0].mxu0 %v80_v26  ;;  %v348_v26 = vld [vmem:[#allocation7 + $0x8] sm:$0xff] }
  0x5a   :  { %613 = vmatprep.mubr.msk.f32.mxu0 %vm801_vm0, %v802_v1  ;;  %v665_v27 = vpack.c.bf16 %v348_v26, %v347_v25 }
  0x5b   :  { %663 = vmatpush3.bf16.msra.mxu1 %v662_v50 }
  0x5c   :  { %666 = vmatpush3.bf16.msra.mxu0 %v665_v27 }
  0x5d   :  { %667 = vmatprep.subr.bf16.mxu0 %v800_v0 }
  0x60   :  { %669 = vmatpush3.bf16.msra.mxu0 %v668_v30 }
  0x61   :  { %670 = vmatprep.subr.bf16.mxu0 %v800_v0 }
  0x64   :  { %672 = vmatpush3.bf16.msra.mxu0 %v671_v33 }
  0x65   :  { %673 = vmatprep.subr.bf16.mxu0 %v800_v0 }
  0x68   :  { %675 = vmatpush3.bf16.msra.mxu0 %v674_v36 }
  0x69   :  { %676 = vmatprep.subr.bf16.mxu0 %v800_v0 }
  0x6c   :  { %678 = vmatpush3.bf16.msra.mxu0 %v677_v39 }
  0x6d   :  { %679 = vmatprep.subr.bf16.mxu0 %v800_v0 }
  0x70   :  { %681 = vmatpush3.bf16.msra.mxu0 %v680_v42 }
  0x71   :  { %682 = vmatprep.subr.bf16.mxu0 %v800_v0 }
  0x74   :  { %684 = vmatpush3.bf16.msra.mxu0 %v683_v45 }
  0x75   :  { %685 = vmatprep.subr.bf16.mxu0 %v800_v0 }
  0x78   :  { %687 = vmatpush3.bf16.msra.mxu0 %v686_v48 }
 0x12c   :  { %v170_v52 = vpop.f32.mrb[0].mxu0 }
 0x12d   :  { %v171_v53 = vadd.f32 %v457_v51, %v170_v52  ;;  %v545_v54 = vpop.f32.mrb[1].mxu0 }
 0x12f   :  { %v176_v55 = vrot.slane %v171_v53, 4  ;;  %v183_v56 = vmul.f32 %v171_v53, %v171_v53 }
 0x131   :  { %v177_v57 = vadd.f32 %v176_v55, %v171_v53  ;;  %v184_v58 = vrot.slane %v183_v56, 4 }
 0x133   :  { %v178_v59 = vrot.slane %v177_v57, 2  ;;  %v185_v60 = vadd.f32 %v184_v58, %v183_v56 }
 0x135   :  { %v179_v61 = vadd.f32 %v178_v59, %v177_v57  ;;  %v186_v62 = vrot.slane %v185_v60, 2 }
 0x137   :  { %v180_v63 = vrot.slane %v179_v61, 1  ;;  %v187_v1 = vadd.f32 %v186_v62, %v185_v60 }
 0x139   :  { %v181_v2 = vadd.f32 %v180_v63, %v179_v61  ;;  %v188_v3 = vrot.slane %v187_v1, 1 }
 0x13b   :  { %v189_v4 = vadd.f32 %v188_v3, %v187_v1  ;;  %v182_v5 = vmul.f32 0.125, %v181_v2 }
 0x13d   :  { %v190_v6 = vmul.f32 0.125, %v189_v4  ;;  %v191_v7 = vmul.f32 %v182_v5, %v182_v5 }
 0x13f   :  { %v192_v8 = vsub.f32 %v190_v6, %v191_v7 }
 0x141   :  { %v193_v9 = vmax.f32 %v192_v8, 0.0  ;;  %v307_v8 = vld [vmem:[%s992_s7] sm:$0x1]  ;;  %s803_s7 = smov [#allocation8]  }
 0x142   :  { %s447_s25 = sshll.u32 %s803_s7, 4  ;;  %s448_s25 = int_to_ptr.vmem [resolvable:$true] %s447_s25 }
 0x143   :  { %v194_v10 = vadd.f32 1e-05, %v193_v9  ;;  %s767_s8 = scalar_lea.vmem %s448_s25, 128  ;;  %p772_p11 = scmp.lt.s32.totalorder %s448_s25, %s448_s25 }
 0x144   :  { %p768_p10 = scmp.ne.s32.totalorder %s448_s25, %s767_s8  ;;  %p773_p12 = scmp.lt.s32.totalorder %s767_s8, %s767_s8 }
 0x145   :  { %697 = vrsqrt.f32 %v194_v10 }
 0x146   :  { %p774_p13 = por %p773_p12, %p772_p11 }
 0x148   :  { %p775_p0 = pnand %p774_p13, %p768_p10 }
 0x14f   :  { %v698_v15 = vpop.eup %697 }
 0x150   :  { %v196_v16 = vmul.f32 %v698_v15, %v174_v13 }
 0x152   :  { %v201_v18 = vrot.slane %v196_v16, %v945_v14  ;;  %v204_v19 = vmul.f32 %v196_v16, %v182_v5 }
 0x154   :  { %v205_v20 = vsub.f32 %v175_v17, %v204_v19  ;;  %v203_v21 = vmul.f32 %v201_v18, %v171_v53 }
 0x156   :  { %v210_v22 = vrot.slane %v205_v20, %v945_v14  ;;  %v459_v20 = vld [vmem:[%s995_s10] ss:$0 sm:$0xff] }
 0x158   :  { %v212_v23 = vadd.f32 %v210_v22, %v203_v21 }
 0x15a   :  { %v213_v24 = vmax.f32 %v212_v23, 0.0 }
 0x15c   :  { %579 = vmatmul.mubr.f32.vlgmr.msra.gmra.mrb[0].mxu1 %v213_v24 }
 0x22f   :  { %v303_v50 = vpop.f32.mrb[0].mxu1 }
 0x230   :  { %v304_v51 = vadd.f32 %v458_v49, %v303_v50  ;;  %v580_v52 = vpop.f32.mrb[1].mxu1 }
 0x232   :  { %v309_v53 = vrot.slane %v304_v51, 4  ;;  %v316_v54 = vmul.f32 %v304_v51, %v304_v51 }
 0x234   :  { %v310_v55 = vadd.f32 %v309_v53, %v304_v51  ;;  %v317_v56 = vrot.slane %v316_v54, 4 }
 0x236   :  { %v311_v57 = vrot.slane %v310_v55, 2  ;;  %v318_v58 = vadd.f32 %v317_v56, %v316_v54 }
 0x238   :  { %v312_v59 = vadd.f32 %v311_v57, %v310_v55  ;;  %v319_v60 = vrot.slane %v318_v58, 2 }
 0x23a   :  { %v313_v61 = vrot.slane %v312_v59, 1  ;;  %v320_v62 = vadd.f32 %v319_v60, %v318_v58 }
 0x23c   :  { %v314_v63 = vadd.f32 %v313_v61, %v312_v59  ;;  %v321_v0 = vrot.slane %v320_v62, 1 }
 0x23e   :  { %v315_v1 = vmul.f32 0.125, %v314_v63  ;;  %v322_v2 = vadd.f32 %v321_v0, %v320_v62 }
 0x240   :  { %v323_v3 = vmul.f32 0.125, %v322_v2  ;;  %v324_v4 = vmul.f32 %v315_v1, %v315_v1 }
 0x242   :  { %v325_v5 = vsub.f32 %v323_v3, %v324_v4 }
 0x244   :  { %v326_v6 = vmax.f32 %v325_v5, 0.0 }
 0x246   :  { %v327_v7 = vadd.f32 1e-05, %v326_v6 }
 0x248   :  { %699 = vrsqrt.f32 %v327_v7 }
 0x252   :  { %v700_v9 = vpop.eup %699 }
 0x253   :  { %v329_v10 = vmul.f32 %v700_v9, %v307_v8 }
 0x255   :  { %v334_v12 = vrot.slane %v329_v10, %v945_v14  ;;  %v337_v13 = vmul.f32 %v329_v10, %v315_v1 }
 0x257   :  { %v338_v15 = vsub.f32 %v308_v11, %v337_v13  ;;  %v336_v16 = vmul.f32 %v334_v12, %v304_v51 }
 0x259   :  { %v343_v17 = vrot.slane %v338_v15, %v945_v14 }
 0x25b   :  { %v345_v18 = vadd.f32 %v343_v17, %v336_v16 }
 0x25d   :  { %v346_v19 = vmax.f32 %v345_v18, 0.0 }
 0x25f   :  { %614 = vmatmul.mubr.f32.vlgmr.msra.gmra.mrb[2].mxu0 %v346_v19 }
 0x332   :  { %v436_v21 = vpop.f32.mrb[2].mxu0 }
 0x333   :  { %v437_v22 = vadd.f32 %v459_v20, %v436_v21  ;;  %v615_v23 = vpop.f32.mrb[3].mxu0 }
 0x335   :  { %440 = vst [vmem:[#allocation8] sm:$0xff] %v437_v22 }
 0x336   :  { %778 = shalt.err (!%p775_p0)
}
 0x337   :  { %s779_s28 = scalar_lea.hbm %s996_s11, 128 }
 0x338   :  { %p780_p1 = scmp.ne.s32.totalorder %s996_s11, %s779_s28  ;;  %p783_p2 = scmp.lt.u32.totalorder %s779_s28, %s996_s11 }
 0x33a   :  { %p785_p3 = pnand %p783_p2, %p780_p1 }
 0x33c   :  { %788 = shalt.err (!%p785_p3)
}
 0x33d   :  { %450 = dma.vmem_to_hbm [thread:$0]  %s448_s25, 128, %s996_s11, [#allocation4]  }
 0x33e   :  { %793 = dma.done.wait [#allocation4], 128  }
 0x33f   :  { %794 = vsyncadd [#allocation4], 4294967168 }
 0x340   :  { %454 = vsyncpa [#allocation3], 1 }
 0x341   :  { %455 = vsyncpa [#allocation6], 1 }
 0x342   :  { %456 = vsyncpa [#allocation4], 1 }

</bundles_post_ra>
